<compile_context>
chip_gen: v7x
topology: tpu7x:2x2x1
jax: 0.10.0
libtpu: 0.0.40
codegen_flags: <defaults>
</compile_context>

<pallas_src>
import math
import jax
import jax.numpy as jnp
from jax.experimental import pallas as pl
from jax.experimental.pallas import tpu as pltpu


def _make_kernel(bt: int, S: int, E: int, Hp: int, L: int, K: int):
    rows = bt * S

    def kernel(xp_ref, wc_ref, bc_ref, whw_ref, bhw_ref, o_ref):
        # xp_ref : (bt, S + K - 1, E) f32   zero-padded input (channels-last)
        # wc_ref : (K, E, Hp)         bf16  per-tap conv weights
        # bc_ref : (1, Hp)            f32   conv bias (zero-padded)
        # whw_ref: (L, Hp, 2*Hp)      bf16  per-layer [gate | linear] weights
        # bhw_ref: (L, 1, 2*Hp)       f32   per-layer [gate | linear] biases
        # o_ref  : (rows, Hp)         f32   lane-dense output slab

        xp = xp_ref[...].astype(jnp.bfloat16)          # cast once for the MXU

        # ---- Conv1d(k=K, pad=K//2) as K shifted matmuls, f32 accumulation --
        h = jnp.dot(xp[:, 0:S, :].reshape(rows, E), wc_ref[0],
                    preferred_element_type=jnp.float32) + bc_ref[...]
        for k in range(1, K):
            h = h + jnp.dot(xp[:, k:k + S, :].reshape(rows, E), wc_ref[k],
                            preferred_element_type=jnp.float32)

        # ---- Highway layers (L static -> unrolled) --------------------------
        for i in range(L):
            z = jnp.dot(h.astype(jnp.bfloat16), whw_ref[i],
                        preferred_element_type=jnp.float32) + bhw_ref[i]
            t = jax.nn.sigmoid(z[:, :Hp])               # gate   (lane-aligned)
            hh = jnp.maximum(z[:, Hp:], 0.0)            # relu(linear)
            h = h + t * (hh - h)                        # H*T + (1-T)*x

        o_ref[...] = h.astype(o_ref.dtype)

    return kernel


def emb_wrapper_pallas(x, w_conv, b_conv, w_gate, b_gate, w_lin, b_lin,
                       batch_tile=None):
    """x: (B, S, E) f32 -> (B, S, H) f32.

    w_conv: (H, E, K) (PyTorch Conv1d layout), b_conv: (H,)
    w_gate/w_lin: (L, H, H) in (in, out) orientation, b_gate/b_lin: (L, H)
    """
    B, S, E = x.shape
    H, _, K = w_conv.shape
    L = w_gate.shape[0]
    pad = K // 2
    Hp = max(128, ((H + 127) // 128) * 128)     # lane-aligned hidden dim
    bt = B if batch_tile is None else batch_tile
    assert B % bt == 0

    # ---- one-time XLA-side layout plumbing (cheap, outside the kernel) -----
    xp = jnp.pad(x, ((0, 0), (pad, pad), (0, 0)))                 # (B, S+K-1, E)

    wc = jnp.transpose(w_conv, (2, 1, 0))                         # (K, E, H)
    wc = jnp.pad(wc, ((0, 0), (0, 0), (0, Hp - H))).astype(jnp.bfloat16)
    bc = jnp.pad(b_conv, (0, Hp - H)).reshape(1, Hp)              # f32

    wg = jnp.pad(w_gate, ((0, 0), (0, Hp - H), (0, Hp - H)))
    wl = jnp.pad(w_lin, ((0, 0), (0, Hp - H), (0, Hp - H)))
    whw = jnp.concatenate([wg, wl], axis=-1).astype(jnp.bfloat16)  # (L, Hp, 2Hp)
    bg = jnp.pad(b_gate, ((0, 0), (0, Hp - H)))
    bl = jnp.pad(b_lin, ((0, 0), (0, Hp - H)))
    bhw = jnp.concatenate([bg, bl], axis=-1)[:, None, :]           # (L, 1, 2Hp)

    kernel = _make_kernel(bt, S, E, Hp, L, K)

    flops = 2 * B * S * (K * E * Hp + L * Hp * (2 * Hp))
    transcendentals = B * S * Hp * L
    bytes_accessed = (xp.size * 4 + wc.size * 2 + bc.size * 4 +
                      whw.size * 2 + bhw.size * 4 + B * S * Hp * 4)

    out2d = pl.pallas_call(
        kernel,
        out_shape=jax.ShapeDtypeStruct((B * S, Hp), x.dtype),
        grid_spec=pltpu.PrefetchScalarGridSpec(
            num_scalar_prefetch=0,
            grid=(pl.cdiv(B, bt),),                    # single step at demo size
            in_specs=[
                pl.BlockSpec((bt, S + K - 1, E), lambda i: (i, 0, 0)),   # xp
                pl.BlockSpec((K, E, Hp), lambda i: (0, 0, 0)),           # wc
                pl.BlockSpec((1, Hp), lambda i: (0, 0)),                 # bc
                pl.BlockSpec((L, Hp, 2 * Hp), lambda i: (0, 0, 0)),      # whw
                pl.BlockSpec((L, 1, 2 * Hp), lambda i: (0, 0, 0)),       # bhw
            ],
            out_specs=pl.BlockSpec((bt * S, Hp), lambda i: (i, 0)),
        ),
        compiler_params=pltpu.CompilerParams(
            dimension_semantics=("parallel",)),
        cost_estimate=pl.CostEstimate(
            flops=flops, transcendentals=transcendentals,
            bytes_accessed=bytes_accessed),
    )(xp, wc, bc, whw, bhw)

    return out2d.reshape(B, S, Hp)[:, :, :H]


def _reference(x, w_conv, b_conv, w_gate, b_gate, w_lin, b_lin):
    """Pure-JAX (f32) mirror of the PyTorch Emb_Wrapper forward."""
    L = w_gate.shape[0]
    K = w_conv.shape[2]
    xt = jnp.transpose(x, (0, 2, 1))                                 # (B, E, S)
    y = jax.lax.conv_general_dilated(
        xt, w_conv, window_strides=(1,),
        padding=((K // 2, K // 2),),
        dimension_numbers=("NCH", "OIH", "NCH"))                     # (B, H, S)
    y = y + b_conv[None, :, None]
    h = jnp.transpose(y, (0, 2, 1))                                  # (B, S, H)
    for i in range(L):
        t = jax.nn.sigmoid(h @ w_gate[i] + b_gate[i])
        hh = jnp.maximum(h @ w_lin[i] + b_lin[i], 0.0)
        h = hh * t + (1.0 - t) * h
    return h


if __name__ == "__main__":
    # Small shapes consistent with the module:
    # batch=2, seq=8, emb_dim=32, hidden_size=32, layer_num=2, kernel=5.
    B, S, E, H, L, K = 2, 8, 32, 32, 2, 5

    key = jax.random.PRNGKey(0)
    ks = jax.random.split(key, 7)

    x = jax.random.normal(ks[0], (B, S, E), jnp.float32)

    # Deterministic parameter init mimicking the PyTorch defaults.
    cb = 1.0 / math.sqrt(E * K)          # Conv1d: U(-1/sqrt(fan_in), +)
    w_conv = jax.random.uniform(ks[1], (H, E, K), jnp.float32, -cb, cb)
    b_conv = jax.random.uniform(ks[2], (H,), jnp.float32, -cb, cb)

    lb = 1.0 / math.sqrt(H)              # Linear: U(-1/sqrt(fan_in), +)
    w_gate = jax.random.uniform(ks[3], (L, H, H), jnp.float32, -lb, lb)
    b_gate = jax.random.uniform(ks[4], (L, H), jnp.float32, -lb, lb)
    w_lin = jax.random.uniform(ks[5], (L, H, H), jnp.float32, -lb, lb)
    b_lin = jax.random.uniform(ks[6], (L, H), jnp.float32, -lb, lb)

    out = emb_wrapper_pallas(x, w_conv, b_conv, w_gate, b_gate, w_lin, b_lin)
    out = jax.block_until_ready(out)

    ref = _reference(x, w_conv, b_conv, w_gate, b_gate, w_lin, b_lin)
    assert out.shape == (B, S, H)
    # bf16 MXU operands (f32 accumulation) -> relaxed tolerance vs f32 reference.
    assert jnp.allclose(out, ref, atol=3e-2, rtol=3e-2), "mismatch vs reference"

    print("KERNEL_OK")
</pallas_src>

<mosaic_0001>
module attributes {stable_mosaic.version = 11 : i64} {
  func.func @kernel(%arg0: i32, %arg1: memref<2x12x32xf32, #tpu.memory_space<vmem>>, %arg2: memref<5x32x128xbf16, #tpu.memory_space<vmem>>, %arg3: memref<1x128xf32, #tpu.memory_space<vmem>>, %arg4: memref<2x128x256xbf16, #tpu.memory_space<vmem>>, %arg5: memref<2x1x256xf32, #tpu.memory_space<vmem>>, %arg6: memref<16x128xf32, #tpu.memory_space<vmem>>) attributes {dimension_semantics = [#tpu.dimension_semantics<parallel>], iteration_bounds = array<i64: 1>, scalar_prefetch = 0 : i64, scratch_operands = 0 : i64, tpu.core_type = #tpu.core_type<tc>, window_params = [{transform_indices = @transform_0, window_bounds = array<i64: 2, 12, 32>}, {pipeline_mode = #tpu.pipeline_mode<synchronous>, transform_indices = @transform_1, window_bounds = array<i64: 5, 32, 128>}, {pipeline_mode = #tpu.pipeline_mode<synchronous>, transform_indices = @transform_2, window_bounds = array<i64: 1, 128>}, {pipeline_mode = #tpu.pipeline_mode<synchronous>, transform_indices = @transform_3, window_bounds = array<i64: 2, 128, 256>}, {pipeline_mode = #tpu.pipeline_mode<synchronous>, transform_indices = @transform_4, window_bounds = array<i64: 2, 1, 256>}, {transform_indices = @transform_5, window_bounds = array<i64: 16, 128>}]} {
    %c0 = arith.constant 0 : index
    %c0_0 = arith.constant 0 : index
    %c0_1 = arith.constant 0 : index
    %0 = vector.load %arg1[%c0, %c0_0, %c0_1] : memref<2x12x32xf32, #tpu.memory_space<vmem>>, vector<2x12x32xf32>
    %1 = arith.truncf %0 : vector<2x12x32xf32> to vector<2x12x32xbf16>
    %2 = vector.extract_strided_slice %1 {offsets = [0, 0, 0], sizes = [2, 8, 32], strides = [1, 1, 1]} : vector<2x12x32xbf16> to vector<2x8x32xbf16>
    %3 = vector.shape_cast %2 : vector<2x8x32xbf16> to vector<16x32xbf16>
    %c0_2 = arith.constant 0 : index
    %c0_3 = arith.constant 0 : index
    %c0_4 = arith.constant 0 : index
    %4 = vector.load %arg2[%c0_2, %c0_3, %c0_4] : memref<5x32x128xbf16, #tpu.memory_space<vmem>>, vector<1x32x128xbf16>
    %5 = vector.shape_cast %4 : vector<1x32x128xbf16> to vector<32x128xbf16>
    %cst = arith.constant dense<0.000000e+00> : vector<16x128xf32>
    %6 = tpu.matmul %3, %5, %cst {dimension_numbers = #tpu.dot_dimension_numbers<[1], [0], [0], [1], [0, 0, 1, 1], [], []>} : vector<16x32xbf16>, vector<32x128xbf16>, vector<16x128xf32> -> vector<16x128xf32>
    %c0_5 = arith.constant 0 : index
    %c0_6 = arith.constant 0 : index
    %7 = vector.load %arg3[%c0_5, %c0_6] : memref<1x128xf32, #tpu.memory_space<vmem>>, vector<1x128xf32>
    %8 = vector.broadcast %7 : vector<1x128xf32> to vector<16x128xf32>
    %9 = arith.addf %6, %8 : vector<16x128xf32>
    %10 = vector.extract_strided_slice %1 {offsets = [0, 1, 0], sizes = [2, 8, 32], strides = [1, 1, 1]} : vector<2x12x32xbf16> to vector<2x8x32xbf16>
    %11 = vector.shape_cast %10 : vector<2x8x32xbf16> to vector<16x32xbf16>
    %c1 = arith.constant 1 : index
    %c0_7 = arith.constant 0 : index
    %c0_8 = arith.constant 0 : index
    %12 = vector.load %arg2[%c1, %c0_7, %c0_8] : memref<5x32x128xbf16, #tpu.memory_space<vmem>>, vector<1x32x128xbf16>
    %13 = vector.shape_cast %12 : vector<1x32x128xbf16> to vector<32x128xbf16>
    %cst_9 = arith.constant dense<0.000000e+00> : vector<16x128xf32>
    %14 = tpu.matmul %11, %13, %cst_9 {dimension_numbers = #tpu.dot_dimension_numbers<[1], [0], [0], [1], [0, 0, 1, 1], [], []>} : vector<16x32xbf16>, vector<32x128xbf16>, vector<16x128xf32> -> vector<16x128xf32>
    %15 = arith.addf %9, %14 : vector<16x128xf32>
    %16 = vector.extract_strided_slice %1 {offsets = [0, 2, 0], sizes = [2, 8, 32], strides = [1, 1, 1]} : vector<2x12x32xbf16> to vector<2x8x32xbf16>
    %17 = vector.shape_cast %16 : vector<2x8x32xbf16> to vector<16x32xbf16>
    %c2 = arith.constant 2 : index
    %c0_10 = arith.constant 0 : index
    %c0_11 = arith.constant 0 : index
    %18 = vector.load %arg2[%c2, %c0_10, %c0_11] : memref<5x32x128xbf16, #tpu.memory_space<vmem>>, vector<1x32x128xbf16>
    %19 = vector.shape_cast %18 : vector<1x32x128xbf16> to vector<32x128xbf16>
    %cst_12 = arith.constant dense<0.000000e+00> : vector<16x128xf32>
    %20 = tpu.matmul %17, %19, %cst_12 {dimension_numbers = #tpu.dot_dimension_numbers<[1], [0], [0], [1], [0, 0, 1, 1], [], []>} : vector<16x32xbf16>, vector<32x128xbf16>, vector<16x128xf32> -> vector<16x128xf32>
    %21 = arith.addf %15, %20 : vector<16x128xf32>
    %22 = vector.extract_strided_slice %1 {offsets = [0, 3, 0], sizes = [2, 8, 32], strides = [1, 1, 1]} : vector<2x12x32xbf16> to vector<2x8x32xbf16>
    %23 = vector.shape_cast %22 : vector<2x8x32xbf16> to vector<16x32xbf16>
    %c3 = arith.constant 3 : index
    %c0_13 = arith.constant 0 : index
    %c0_14 = arith.constant 0 : index
    %24 = vector.load %arg2[%c3, %c0_13, %c0_14] : memref<5x32x128xbf16, #tpu.memory_space<vmem>>, vector<1x32x128xbf16>
    %25 = vector.shape_cast %24 : vector<1x32x128xbf16> to vector<32x128xbf16>
    %cst_15 = arith.constant dense<0.000000e+00> : vector<16x128xf32>
    %26 = tpu.matmul %23, %25, %cst_15 {dimension_numbers = #tpu.dot_dimension_numbers<[1], [0], [0], [1], [0, 0, 1, 1], [], []>} : vector<16x32xbf16>, vector<32x128xbf16>, vector<16x128xf32> -> vector<16x128xf32>
    %27 = arith.addf %21, %26 : vector<16x128xf32>
    %28 = vector.extract_strided_slice %1 {offsets = [0, 4, 0], sizes = [2, 8, 32], strides = [1, 1, 1]} : vector<2x12x32xbf16> to vector<2x8x32xbf16>
    %29 = vector.shape_cast %28 : vector<2x8x32xbf16> to vector<16x32xbf16>
    %c4 = arith.constant 4 : index
    %c0_16 = arith.constant 0 : index
    %c0_17 = arith.constant 0 : index
    %30 = vector.load %arg2[%c4, %c0_16, %c0_17] : memref<5x32x128xbf16, #tpu.memory_space<vmem>>, vector<1x32x128xbf16>
    %31 = vector.shape_cast %30 : vector<1x32x128xbf16> to vector<32x128xbf16>
    %cst_18 = arith.constant dense<0.000000e+00> : vector<16x128xf32>
    %32 = tpu.matmul %29, %31, %cst_18 {dimension_numbers = #tpu.dot_dimension_numbers<[1], [0], [0], [1], [0, 0, 1, 1], [], []>} : vector<16x32xbf16>, vector<32x128xbf16>, vector<16x128xf32> -> vector<16x128xf32>
    %33 = arith.addf %27, %32 : vector<16x128xf32>
    %34 = arith.truncf %33 : vector<16x128xf32> to vector<16x128xbf16>
    %c0_19 = arith.constant 0 : index
    %c0_20 = arith.constant 0 : index
    %c0_21 = arith.constant 0 : index
    %35 = vector.load %arg4[%c0_19, %c0_20, %c0_21] : memref<2x128x256xbf16, #tpu.memory_space<vmem>>, vector<1x128x256xbf16>
    %36 = vector.shape_cast %35 : vector<1x128x256xbf16> to vector<128x256xbf16>
    %cst_22 = arith.constant dense<0.000000e+00> : vector<16x256xf32>
    %37 = tpu.matmul %34, %36, %cst_22 {dimension_numbers = #tpu.dot_dimension_numbers<[1], [0], [0], [1], [0, 0, 1, 1], [], []>} : vector<16x128xbf16>, vector<128x256xbf16>, vector<16x256xf32> -> vector<16x256xf32>
    %c0_23 = arith.constant 0 : index
    %c0_24 = arith.constant 0 : index
    %c0_25 = arith.constant 0 : index
    %38 = vector.load %arg5[%c0_23, %c0_24, %c0_25] : memref<2x1x256xf32, #tpu.memory_space<vmem>>, vector<1x1x256xf32>
    %39 = vector.shape_cast %38 : vector<1x1x256xf32> to vector<1x256xf32>
    %40 = vector.broadcast %39 : vector<1x256xf32> to vector<16x256xf32>
    %41 = arith.addf %37, %40 : vector<16x256xf32>
    %42 = vector.extract_strided_slice %41 {offsets = [0, 0], sizes = [16, 128], strides = [1, 1]} : vector<16x256xf32> to vector<16x128xf32>
    %43 = arith.negf %42 : vector<16x128xf32>
    %44 = math.exp %43 : vector<16x128xf32>
    %cst_26 = arith.constant 1.000000e+00 : f32
    %45 = vector.broadcast %cst_26 : f32 to vector<16x128xf32>
    %46 = arith.addf %45, %44 : vector<16x128xf32>
    %47 = arith.divf %45, %46 : vector<16x128xf32>
    %48 = vector.extract_strided_slice %41 {offsets = [0, 128], sizes = [16, 128], strides = [1, 1]} : vector<16x256xf32> to vector<16x128xf32>
    %cst_27 = arith.constant 0.000000e+00 : f32
    %49 = vector.broadcast %cst_27 : f32 to vector<16x128xf32>
    %50 = arith.maximumf %48, %49 : vector<16x128xf32>
    %51 = arith.subf %50, %33 : vector<16x128xf32>
    %52 = arith.mulf %47, %51 : vector<16x128xf32>
    %53 = arith.addf %33, %52 : vector<16x128xf32>
    %54 = arith.truncf %53 : vector<16x128xf32> to vector<16x128xbf16>
    %c1_28 = arith.constant 1 : index
    %c0_29 = arith.constant 0 : index
    %c0_30 = arith.constant 0 : index
    %55 = vector.load %arg4[%c1_28, %c0_29, %c0_30] : memref<2x128x256xbf16, #tpu.memory_space<vmem>>, vector<1x128x256xbf16>
    %56 = vector.shape_cast %55 : vector<1x128x256xbf16> to vector<128x256xbf16>
    %cst_31 = arith.constant dense<0.000000e+00> : vector<16x256xf32>
    %57 = tpu.matmul %54, %56, %cst_31 {dimension_numbers = #tpu.dot_dimension_numbers<[1], [0], [0], [1], [0, 0, 1, 1], [], []>} : vector<16x128xbf16>, vector<128x256xbf16>, vector<16x256xf32> -> vector<16x256xf32>
    %c1_32 = arith.constant 1 : index
    %c0_33 = arith.constant 0 : index
    %c0_34 = arith.constant 0 : index
    %58 = vector.load %arg5[%c1_32, %c0_33, %c0_34] : memref<2x1x256xf32, #tpu.memory_space<vmem>>, vector<1x1x256xf32>
    %59 = vector.shape_cast %58 : vector<1x1x256xf32> to vector<1x256xf32>
    %60 = vector.broadcast %59 : vector<1x256xf32> to vector<16x256xf32>
    %61 = arith.addf %57, %60 : vector<16x256xf32>
    %62 = vector.extract_strided_slice %61 {offsets = [0, 0], sizes = [16, 128], strides = [1, 1]} : vector<16x256xf32> to vector<16x128xf32>
    %63 = arith.negf %62 : vector<16x128xf32>
    %64 = math.exp %63 : vector<16x128xf32>
    %cst_35 = arith.constant 1.000000e+00 : f32
    %65 = vector.broadcast %cst_35 : f32 to vector<16x128xf32>
    %66 = arith.addf %65, %64 : vector<16x128xf32>
    %67 = arith.divf %65, %66 : vector<16x128xf32>
    %68 = vector.extract_strided_slice %61 {offsets = [0, 128], sizes = [16, 128], strides = [1, 1]} : vector<16x256xf32> to vector<16x128xf32>
    %cst_36 = arith.constant 0.000000e+00 : f32
    %69 = vector.broadcast %cst_36 : f32 to vector<16x128xf32>
    %70 = arith.maximumf %68, %69 : vector<16x128xf32>
    %71 = arith.subf %70, %53 : vector<16x128xf32>
    %72 = arith.mulf %67, %71 : vector<16x128xf32>
    %73 = arith.addf %53, %72 : vector<16x128xf32>
    %c0_37 = arith.constant 0 : index
    %c0_38 = arith.constant 0 : index
    %74 = vector.load %arg6[%c0_37, %c0_38] : memref<16x128xf32, #tpu.memory_space<vmem>>, vector<16x128xf32>
    tpu.vector_store %arg6[%c0_37, %c0_38], %73 {strides = array<i32>} : memref<16x128xf32, #tpu.memory_space<vmem>>, vector<16x128xf32>,
    return
  }
  func.func @transform_0(%arg0: i32) -> (i32, i32, i32) {
    %c0_i32 = arith.constant 0 : i32
    %c0_i32_0 = arith.constant 0 : i32
    %c0_i32_1 = arith.constant 0 : i32
    return %arg0, %c0_i32, %c0_i32_0 : i32, i32, i32
  }
  func.func @transform_1(%arg0: i32) -> (i32, i32, i32) {
    %c0_i32 = arith.constant 0 : i32
    %c0_i32_0 = arith.constant 0 : i32
    %c0_i32_1 = arith.constant 0 : i32
    %c0_i32_2 = arith.constant 0 : i32
    return %c0_i32, %c0_i32_0, %c0_i32_1 : i32, i32, i32
  }
  func.func @transform_2(%arg0: i32) -> (i32, i32) {
    %c0_i32 = arith.constant 0 : i32
    %c0_i32_0 = arith.constant 0 : i32
    %c0_i32_1 = arith.constant 0 : i32
    return %c0_i32, %c0_i32_0 : i32, i32
  }
  func.func @transform_3(%arg0: i32) -> (i32, i32, i32) {
    %c0_i32 = arith.constant 0 : i32
    %c0_i32_0 = arith.constant 0 : i32
    %c0_i32_1 = arith.constant 0 : i32
    %c0_i32_2 = arith.constant 0 : i32
    return %c0_i32, %c0_i32_0, %c0_i32_1 : i32, i32, i32
  }
  func.func @transform_4(%arg0: i32) -> (i32, i32, i32) {
    %c0_i32 = arith.constant 0 : i32
    %c0_i32_0 = arith.constant 0 : i32
    %c0_i32_1 = arith.constant 0 : i32
    %c0_i32_2 = arith.constant 0 : i32
    return %c0_i32, %c0_i32_0, %c0_i32_1 : i32, i32, i32
  }
  func.func @transform_5(%arg0: i32) -> (i32, i32) {
    %c0_i32 = arith.constant 0 : i32
    %c0_i32_0 = arith.constant 0 : i32
    return %arg0, %c0_i32 : i32, i32
  }
}

</mosaic_0001>

<bundles_post_ra>
// kernel: tpu_custom_call.1
= control target key start
LH: loop header
LB: loop body
LE: loop exit
PB: predicated region body
PF: predicated region fallthrough
CT: control target
= control target key end

     0   :  { %10 = vsyncpa [#allocation3], 0  ;;  %s1311_s0 = inlined_call_operand.vmem [shape: f32[2,12,32], index: 0, kind: input, shape index: {}]   ;;  %s1312_s1 = inlined_call_operand.hbm [shape: bf16[5,32,128], index: 1, kind: input, shape index: {}]   ;;  %s1313_s2 = inlined_call_operand.vmem [shape: f32[1,128], index: 2, kind: input, shape index: {}]   ;;  %s1314_s3 = inlined_call_operand.hbm [shape: bf16[2,128,256], index: 3, kind: input, shape index: {}]   ;;  %s1315_s4 = inlined_call_operand.vmem [shape: f32[2,1,256], index: 4, kind: input, shape index: {}]   ;;  %s1316_s5 = inlined_call_operand.hbm [shape: f32[16,128], index: 5, kind: output, shape index: {}]  }
   0x1   :  { %11 = vsyncpa [#allocation6], 0 }
   0x2   :  { %12 = vsyncpa [#allocation4], 0  ;;  %s1141_s18 = smov [#allocation2]   ;;  %s1069_s22 = scalar_lea.hbm %s1312_s1, 1280 }
   0x3   :  { %s20_s19 = sshll.u32 %s1141_s18, 4  ;;  %p1070_p0 = scmp.ne.s32.totalorder %s1312_s1, %s1069_s22  ;;  %s21_s19 = int_to_ptr.vmem [resolvable:$true] %s20_s19 }
   0x4   :  { %p1073_p1 = scmp.lt.u32.totalorder %s1069_s22, %s1312_s1 }
   0x6   :  { %p1075_p2 = pnand %p1073_p1, %p1070_p0 }
   0x8   :  { %1078 = shalt.err (!%p1075_p2)
}
   0x9   :  { %s1079_s27 = scalar_lea.vmem %s21_s19, 1280  ;;  %p1084_p4 = scmp.lt.s32.totalorder %s21_s19, %s21_s19 }
   0xa   :  { %p1080_p3 = scmp.ne.s32.totalorder %s21_s19, %s1079_s27  ;;  %p1085_p5 = scmp.lt.s32.totalorder %s1079_s27, %s1079_s27 }
   0xc   :  { %p1086_p6 = por %p1085_p5, %p1084_p4 }
   0xe   :  { %p1087_p7 = pnand %p1086_p6, %p1080_p3 }
  0x10   :  { %1090 = shalt.err (!%p1087_p7)
}
  0x11   :  { %s1142_s28 = smov 64   ;;  %s1143_s29 = smov 4  }
  0x12   :  { %26 = dma.hbm_to_vmem [thread:$0]  %s1312_s1, 1280, %s21_s19, [#allocation3], %s1142_s28, %s1142_s28, %s1143_s29  }
  0x13   :  { %s1144_s7 = smov [#allocation5]   ;;  %s1091_s11 = scalar_lea.hbm %s1314_s3, 4096 }
  0x14   :  { %s34_s8 = sshll.u32 %s1144_s7, 4  ;;  %p1092_p8 = scmp.ne.s32.totalorder %s1314_s3, %s1091_s11  ;;  %s35_s8 = int_to_ptr.vmem [resolvable:$true] %s34_s8 }
  0x15   :  { %p1095_p9 = scmp.lt.u32.totalorder %s1091_s11, %s1314_s3 }
  0x17   :  { %p1097_p10 = pnand %p1095_p9, %p1092_p8 }
  0x19   :  { %1100 = shalt.err (!%p1097_p10)
}
  0x1a   :  { %s1101_s16 = scalar_lea.vmem %s35_s8, 4096  ;;  %p1106_p12 = scmp.lt.s32.totalorder %s35_s8, %s35_s8 }
  0x1b   :  { %p1102_p11 = scmp.ne.s32.totalorder %s35_s8, %s1101_s16  ;;  %p1107_p13 = scmp.lt.s32.totalorder %s1101_s16, %s1101_s16 }
  0x1d   :  { %p1108_p0 = por %p1107_p13, %p1106_p12 }
  0x1f   :  { %p1109_p1 = pnand %p1108_p0, %p1102_p11 }
  0x21   :  { %1112 = shalt.err (!%p1109_p1)
}
  0x22   :  { %s1145_s1 = smov 128   ;;  %s1146_s17 = smov 8  }
  0x23   :  { %40 = dma.hbm_to_vmem [thread:$0]  %s1314_s3, 4096, %s35_s8, [#allocation6], %s1145_s1, %s1145_s1, %s1146_s17  }
  0x24   :  { %1135 = dma.done.wait [#allocation3], 1280  }
  0x25   :  { %1136 = vsyncadd [#allocation3], 4294966016 }
  0x26   :  { %1137 = dma.done.wait [#allocation6], 4096  }
  0x27   :  { %1138 = vsyncadd [#allocation6], 4294963200  ;;  %v1147_v0 = vmov 0.0   ;;  %vm1148_vm0 = vmmov 0   ;;  %v995_v1 = vld [vmem:[#allocation2] sm:$0xff]   ;;  %v996_v2 = vld [vmem:[#allocation2 + $0x8] sm:$0xff]  }
  0x28   :  { %927 = vmatprep.subr.bf16.mxu0 %v1147_v0  ;;  %931 = vmatprep.mubr.msk.bf16.mxu0 %vm1148_vm0, %v1147_v0  ;;  %v50_v3 = vld [vmem:[%s1311_s0] sm:$0xff]  ;;  %v52_v4 = vld [vmem:[%s1311_s0 + $0x10] sm:$0xff]  ;;  %v51_v8 = vld [vmem:[%s1311_s0 + $0x8] sm:$0xf]  ;;  %vm84_vm1 = vcmask 261120   ;;  %vm232_vm5 = vcmask 1042432  }
  0x29   :  { %928 = vmatpush3.bf16.msra.mxu0 %v995_v1  ;;  %v1218_v5 = vpack.c.bf16 %v50_v3, %v50_v3  ;;  %v1220_v6 = vpack.c.bf16 %v52_v4, %v52_v4  ;;  %v907_v7 = vpack.c.bf16 %v52_v4, %v50_v3  ;;  %v53_v13 = vld [vmem:[%s1311_s0 + $0x18] sm:$0xf]  ;;  %v997_v14 = vld [vmem:[#allocation2 + $0x10] sm:$0xff]   ;;  %v1232_v15 = vpack.c.bf16 %v51_v8, %v51_v8  ;;  %v1008_v35 = vld [vmem:[#allocation5 + $0x14] ss:$8 sps:$4 sm:$0xff]  }
  0x2a   :  { %929 = vmatprep.subr.bf16.mxu0 %v1147_v0  ;;  %v1234_v16 = vpack.c.bf16 %v53_v13, %v53_v13  ;;  %vm135_vm2 = vsmask.f32 3328  ;;  %vm136_vm3 = vsmask.f32 7440  ;;  %v998_v25 = vld [vmem:[#allocation2 + $0x18] sm:$0xff]   ;;  %v999_v36 = vld [vmem:[#allocation2 + $0x20] sm:$0xff]  }
  0x2b   :  { %v139_v9 = vshrl.u32 %v1218_v5, 16  ;;  %v142_v10 = vshll.u32 %v1218_v5, 16  ;;  %v153_v11 = vshrl.u32 %v1220_v6, 16  ;;  %v156_v12 = vshll.u32 %v1220_v6, 16  ;;  %vm137_vm4 = vmor %vm135_vm2, %vm136_vm3  ;;  %v1005_v32 = vld [vmem:[#allocation5 + $0x4] ss:$8 sps:$4 sm:$0xff]  }
  0x2c   :  { %v148_v22 = vshll.u32 %v1232_v15, 16  ;;  %v162_v24 = vshll.u32 %v1234_v16, 16  ;;  %v1007_v34 = vld [vmem:[#allocation5] ss:$8 sps:$4 sm:$0xff]   ;;  %vm233_vm6 = vcmask 1046532   ;;  %584 = vmatprep.subr.bf16.mxu1 %v1005_v32  ;;  %v854_v40 = vrot.slane %v1218_v5, 9 }
  0x2d   :  { %930 = vmatpush3.bf16.msra.mxu0 %v996_v2  ;;  %v141_v17 = vrot.slane %v139_v9, 4  ;;  %v144_v18 = vrot.slane %v142_v10, 5  ;;  %v155_v19 = vrot.slane %v153_v11, 4  ;;  %v158_v20 = vrot.slane %v156_v12, 5  ;;  %585 = vmatpush1.bf16.msra.mxu1 %v1007_v34  ;;  %v1010_v37 = vld [vmem:[#allocation5 + $0x10] ss:$8 sps:$4 sm:$0xff]   ;;  %vm1245_vm7 = vmor %vm232_vm5, %vm233_vm6 }
  0x2e   :  { %935 = vmatprep.subr.bf16.mxu0 %v1147_v0  ;;  %v150_v27 = vrot.slane %v148_v22, 5  ;;  %v164_v29 = vrot.slane %v162_v24, 5  ;;  %586 = vmatprep.subr.bf16.mxu1 %v1008_v35  ;;  %v1011_v38 = vld [vmem:[#allocation5 + $0x24] ss:$8 sps:$4 sm:$0xff]   ;;  %v1000_v41 = vld [vmem:[#allocation2 + $0x28] sm:$0xff]   ;;  %v237_v42 = vrot.slane %v1232_v15, 5 }
  0x2f   :  { %v145_v21 = vor.u32 %v144_v18, %v141_v17  ;;  %v159_v23 = vor.u32 %v158_v20, %v155_v19  ;;  %v855_v43 = vrot.slane %v1220_v6, 9  ;;  %v241_v44 = vrot.slane %v1234_v16, 5  ;;  %v1013_v45 = vld [vmem:[#allocation5 + $0x20] ss:$8 sps:$4 sm:$0xff]   ;;  %v1014_v47 = vld [vmem:[#allocation5 + $0x34] ss:$8 sps:$4 sm:$0xff]  }
  0x30   :  { %932 = vmatmul.mubr.msk.bf16.vlgmr.msra.gmra.mrb[0].mxu0 %vm84_vm1, %v907_v7  ;;  %v312_v46 = vrot.slane %v139_v9, 5  ;;  %v313_v48 = vrot.slane %v142_v10, 6  ;;  %v322_v49 = vrot.slane %v153_v11, 5  ;;  %v323_v50 = vrot.slane %v156_v12, 6  ;;  %v1016_v51 = vld [vmem:[#allocation5 + $0x30] ss:$8 sps:$4 sm:$0xff]  }
  0x31   :  { %936 = vmatpush3.bf16.msra.mxu0 %v997_v14  ;;  %939 = vmatprep.mubr.msk.bf16.mxu0 %vm1148_vm0, %v1147_v0  ;;  %v146_v26 = vrot.slane %v145_v21, 4  ;;  %v160_v28 = vrot.slane %v159_v23, 4  ;;  %v238_v52 = vsel %vm1245_vm7, %v854_v40, %v237_v42  ;;  %v242_v53 = vsel %vm1245_vm7, %v855_v43, %v241_v44  ;;  %v1017_v56 = vld [vmem:[#allocation5 + $0x44] ss:$8 sps:$4 sm:$0xff]   ;;  %v1019_v2 = vld [vmem:[#allocation5 + $0x40] ss:$8 sps:$4 sm:$0xff]  }
  0x32   :  { %937 = vmatprep.subr.bf16.mxu0 %v1147_v0  ;;  %587 = vmatpush1.bf16.msra.mxu1 %v1010_v37  ;;  %v316_v54 = vshrl.u32 %v1232_v15, 16  ;;  %v326_v55 = vshrl.u32 %v1234_v16, 16  ;;  %v856_v57 = vcombine.low %v238_v52, %v242_v53  ;;  %v314_v58 = vor.u32 %v313_v48, %v312_v46  ;;  %v1001_v60 = vld [vmem:[#allocation2 + $0x30] sm:$0xff]   ;;  %v1020_v3 = vld [vmem:[#allocation5 + $0x54] ss:$8 sps:$4 sm:$0xff]   ;;  %v1002_v4 = vld [vmem:[#allocation2 + $0x38] sm:$0xff]  }
  0x33   :  { %v151_v30 = vsel %vm137_vm4, %v146_v26, %v150_v27  ;;  %v165_v31 = vsel %vm137_vm4, %v160_v28, %v164_v29  ;;  %588 = vmatprep.subr.bf16.mxu1 %v1011_v38  ;;  %v319_v59 = vrot.slane %v148_v22, 6  ;;  %v324_v62 = vor.u32 %v323_v50, %v322_v49  ;;  %v1022_v11 = vld [vmem:[#allocation5 + $0x50] ss:$8 sps:$4 sm:$0xff]   ;;  %v1023_v12 = vld [vmem:[#allocation5 + $0x64] ss:$8 sps:$4 sm:$0xff]  }
  0x34   :  { %v850_v33 = vcombine.low %v151_v30, %v165_v31  ;;  %v318_v61 = vrot.slane %v316_v54, 5  ;;  %v328_v63 = vrot.slane %v326_v55, 5  ;;  %v329_v1 = vrot.slane %v162_v24, 6  ;;  %v1003_v18 = vld [vmem:[#allocation2 + $0x40] sm:$0xff]   ;;  %v1004_v19 = vld [vmem:[#allocation2 + $0x48] sm:$0xff]  }
  0x35   :  { %938 = vmatpush3.bf16.msra.mxu0 %v998_v25  ;;  %vm309_vm8 = vsmask.f32 2304  ;;  %vm310_vm9 = vsmask.f32 6416  ;;  %v315_v7 = vrot.slane %v314_v58, 4  ;;  %v325_v9 = vrot.slane %v324_v62, 4 }
  0x36   :  { %943 = vmatprep.subr.bf16.mxu0 %v1147_v0  ;;  %589 = vmatpush1.bf16.msra.mxu1 %v1013_v45  ;;  %v320_v8 = vor.u32 %v319_v59, %v318_v61  ;;  %v330_v10 = vor.u32 %v329_v1, %v328_v63  ;;  %vm311_vm10 = vmor %vm309_vm8, %vm310_vm9  ;;  %vm398_vm11 = vcmask 1041408   ;;  %vm399_vm12 = vcmask 1045508   ;;  %v1025_v27 = vld [vmem:[#allocation5 + $0x60] ss:$8 sps:$4 sm:$0xff]   ;;  %v1026_v28 = vld [vmem:[#allocation5 + $0x74] ss:$8 sps:$4 sm:$0xff]  }
  0x37   :  { %590 = vmatprep.subr.bf16.mxu1 %v1014_v47  ;;  %v864_v20 = vrot.slane %v1218_v5, 10  ;;  %v403_v21 = vrot.slane %v1232_v15, 6  ;;  %v865_v22 = vrot.slane %v1220_v6, 10  ;;  %v407_v23 = vrot.slane %v1234_v16, 6  ;;  %vm400_vm13 = vmor %vm398_vm11, %vm399_vm12  ;;  %v1028_v29 = vld [vmem:[#allocation5 + $0x70] ss:$8 sps:$4 sm:$0xff]  }
  0x38   :  { %v321_v13 = vsel %vm311_vm10, %v315_v7, %v320_v8  ;;  %v331_v14 = vsel %vm311_vm10, %v325_v9, %v330_v10  ;;  %v1149_v5 = vmov 0   ;;  %v841_v6 = vld [vmem:[%s1313_s2] ss:$0 sm:$0xff]  ;;  %v1031_v34 = vld [vmem:[#allocation5 + $0x84] ss:$8 sps:$4 sm:$0xff]   ;;  %v494_v50 = vlaneseq }
  0x39   :  { %v860_v17 = vcombine.low %v321_v13, %v331_v14  ;;  %v404_v24 = vsel %vm400_vm13, %v864_v20, %v403_v21  ;;  %v408_v25 = vsel %vm400_vm13, %v865_v22, %v407_v23  ;;  %616 = vmatprep.mubr.bf16.mxu1 %v1149_v5  ;;  %v1029_v35 = vld [vmem:[#allocation5 + $0x80] ss:$8 sps:$4 sm:$0xff]   ;;  %v1032_v37 = vld [vmem:[#allocation5 + $0x90] ss:$8 sps:$4 sm:$0xff]   ;;  %v1037_v38 = vld [vmem:[#allocation5 + $0xa4] ss:$8 sps:$4 sm:$0xff]  }
  0x3a   :  { %591 = vmatpush1.bf16.msra.mxu1 %v1016_v51  ;;  %v866_v26 = vcombine.low %v404_v24, %v408_v25  ;;  %v1035_v39 = vld [vmem:[#allocation5 + $0xa0] ss:$8 sps:$4 sm:$0xff]   ;;  %v1040_v40 = vld [vmem:[#allocation5 + $0xb4] ss:$8 sps:$4 sm:$0xff]   ;;  %v1043_v42 = vld [vmem:[#allocation5 + $0xc4] ss:$8 sps:$4 sm:$0xff]  }
  0x3b   :  { %592 = vmatprep.subr.bf16.mxu1 %v1017_v56  ;;  %v1041_v43 = vld [vmem:[#allocation5 + $0xc0] ss:$8 sps:$4 sm:$0xff]   ;;  %v1046_v44 = vld [vmem:[#allocation5 + $0xd4] ss:$8 sps:$4 sm:$0xff]   ;;  %v1044_v45 = vld [vmem:[#allocation5 + $0xd0] ss:$8 sps:$4 sm:$0xff]  }
  0x3c   :  { %940 = vmatmul.mubr.msk.bf16.vlgmr.msra.gmra.mrb[0].mxu0 %vm84_vm1, %v850_v33  ;;  %v1049_v46 = vld [vmem:[#allocation5 + $0xe4] ss:$8 sps:$4 sm:$0xff]   ;;  %v1047_v47 = vld [vmem:[#allocation5 + $0xe0] ss:$8 sps:$4 sm:$0xff]   ;;  %v1052_v48 = vld [vmem:[#allocation5 + $0xf4] ss:$8 sps:$4 sm:$0xff]  }
  0x3d   :  { %944 = vmatpush3.bf16.msra.mxu0 %v999_v36  ;;  %947 = vmatprep.mubr.msk.bf16.mxu0 %vm1148_vm0, %v1147_v0  ;;  %v1034_v36 = vld [vmem:[#allocation5 + $0x94] ss:$8 sps:$4 sm:$0xff]   ;;  %v1050_v49 = vld [vmem:[#allocation5 + $0xf0] ss:$8 sps:$4 sm:$0xff]   ;;  %v495_v51 = vshrl.u32 %v494_v50, 7 }
  0x3e   :  { %945 = vmatprep.subr.bf16.mxu0 %v1147_v0  ;;  %593 = vmatpush1.bf16.msra.mxu1 %v1019_v2  ;;  %v492_v53 = vld [vmem:[%s1315_s4] sm:$0x3]  ;;  %v888_v23 = vld [vmem:[%s1315_s4 + $0x2] sm:$0x3]  ;;  %s1150_s4 = smov [#allocation7]  }
  0x3f   :  { %594 = vmatprep.subr.bf16.mxu1 %v1020_v3  ;;  %v496_v52 = vsub.s32 0, %v495_v51  ;;  %v500_v63 = vsub.s32 1, %v495_v51  ;;  %s828_s6 = sshll.u32 %s1150_s4, 4  ;;  %s829_s6 = int_to_ptr.vmem [resolvable:$true] %s828_s6 }
  0x40   :  { %s1113_s7 = scalar_lea.vmem %s829_s6, 256  ;;  %p1118_p3 = scmp.lt.s32.totalorder %s829_s6, %s829_s6 }
  0x41   :  { %946 = vmatpush3.bf16.msra.mxu0 %v1000_v41  ;;  %v1038_v41 = vld [vmem:[#allocation5 + $0xb0] ss:$8 sps:$4 sm:$0xff]   ;;  %v497_v54 = vrot.slane %v492_v53, %v496_v52  ;;  %v501_v2 = vrot.slane %v492_v53, %v500_v63  ;;  %v671_v24 = vrot.slane %v888_v23, %v496_v52  ;;  %p1114_p2 = scmp.ne.s32.totalorder %s829_s6, %s1113_s7  ;;  %p1119_p4 = scmp.lt.s32.totalorder %s1113_s7, %s1113_s7 }
  0x42   :  { %951 = vmatprep.subr.bf16.mxu0 %v1147_v0  ;;  %595 = vmatpush1.bf16.msra.mxu1 %v1022_v11 }
  0x43   :  { %596 = vmatprep.subr.bf16.mxu1 %v1023_v12  ;;  %p1120_p5 = por %p1119_p4, %p1118_p3 }
  0x45   :  { %p1121_p6 = pnand %p1120_p5, %p1114_p2 }
  0x46   :  { %597 = vmatpush1.bf16.msra.mxu1 %v1025_v27 }
  0x47   :  { %598 = vmatprep.subr.bf16.mxu1 %v1026_v28 }
  0x48   :  { %948 = vmatmul.mubr.msk.bf16.vlgmr.msra.gmra.mrb[0].mxu0 %vm84_vm1, %v856_v57 }
  0x49   :  { %952 = vmatpush3.bf16.msra.mxu0 %v1001_v60  ;;  %955 = vmatprep.mubr.msk.bf16.mxu0 %vm1148_vm0, %v1147_v0 }
  0x4a   :  { %953 = vmatprep.subr.bf16.mxu0 %v1147_v0  ;;  %599 = vmatpush1.bf16.msra.mxu1 %v1028_v29 }
  0x4b   :  { %758 = vmatprep.subr.bf16.mxu1 %v1031_v34 }
  0x4d   :  { %954 = vmatpush3.bf16.msra.mxu0 %v1002_v4 }
  0x4e   :  { %959 = vmatprep.subr.bf16.mxu0 %v1147_v0 }
  0x54   :  { %956 = vmatmul.mubr.msk.bf16.vlgmr.msra.gmra.mrb[0].mxu0 %vm84_vm1, %v860_v17 }
  0x55   :  { %960 = vmatpush3.bf16.msra.mxu0 %v1003_v18  ;;  %963 = vmatprep.mubr.msk.bf16.mxu0 %vm1148_vm0, %v1147_v0 }
  0x56   :  { %961 = vmatprep.subr.bf16.mxu0 %v1147_v0 }
  0x59   :  { %962 = vmatpush3.bf16.msra.mxu0 %v1004_v19 }
  0x60   :  { %964 = vmatmul.mubr.msk.bf16.vlgmr.msra.gmra.mrb[0].mxu0 %vm84_vm1, %v866_v26 }
 0x133   :  { %v466_v0 = vpop.f32.mrb[0].mxu0 }
 0x134   :  { %v965_v15 = vpop.f32.mrb[1].mxu0  ;;  %v1280_v30 = vadd.f32 %v841_v6, %v466_v0 }
 0x135   :  { %v469_v16 = vpop.f32.mrb[2].mxu0 }
 0x136   :  { %v1282_v31 = vadd.f32 %v841_v6, %v469_v16  ;;  %v966_v32 = vpop.f32.mrb[3].mxu0  ;;  %v675_v16 = vrot.slane %v888_v23, %v500_v63 }
 0x138   :  { %v475_v33 = vpack.c.bf16 %v1282_v31, %v1280_v30 }
 0x13a   :  { %617 = vmatmul.mubr.bf16.vlgmr.msra.gmra.mrb[0].mxu1 %v475_v33 }
 0x13b   :  { %790 = vmatprep.mubr.bf16.mxu1 %v1149_v5  ;;  %759 = vmatpush1.bf16.msra.mxu1 %v1029_v35 }
 0x13c   :  { %760 = vmatprep.subr.bf16.mxu1 %v1034_v36 }
 0x13f   :  { %761 = vmatpush1.bf16.msra.mxu1 %v1032_v37 }
 0x140   :  { %762 = vmatprep.subr.bf16.mxu1 %v1037_v38 }
 0x143   :  { %763 = vmatpush1.bf16.msra.mxu1 %v1035_v39 }
 0x144   :  { %764 = vmatprep.subr.bf16.mxu1 %v1040_v40 }
 0x147   :  { %765 = vmatpush1.bf16.msra.mxu1 %v1038_v41 }
 0x148   :  { %766 = vmatprep.subr.bf16.mxu1 %v1043_v42 }
 0x14b   :  { %767 = vmatpush1.bf16.msra.mxu1 %v1041_v43 }
 0x14c   :  { %768 = vmatprep.subr.bf16.mxu1 %v1046_v44 }
 0x14f   :  { %769 = vmatpush1.bf16.msra.mxu1 %v1044_v45 }
 0x150   :  { %770 = vmatprep.subr.bf16.mxu1 %v1049_v46 }
 0x153   :  { %771 = vmatpush1.bf16.msra.mxu1 %v1047_v47 }
 0x154   :  { %772 = vmatprep.subr.bf16.mxu1 %v1052_v48 }
 0x157   :  { %773 = vmatpush1.bf16.msra.mxu1 %v1050_v49 }
 0x20d   :  { %v618_v55 = vpop.f32.mrb[0].mxu1 }
 0x20e   :  { %v619_v56 = vadd.f32 %v618_v55, %v497_v54  ;;  %v620_v57 = vpop.f32.mrb[1].mxu1 }
 0x20f   :  { %v622_v58 = vpop.f32.mrb[2].mxu1  ;;  %v621_v8 = vadd.f32 %v620_v57, %v501_v2 }
 0x210   :  { %v886_v59 = vmul.f32 -1.442695, %v619_v56  ;;  %v623_v60 = vadd.f32 %v622_v58, %v497_v54  ;;  %v624_v61 = vpop.f32.mrb[3].mxu1 }
 0x211   :  { %v625_v9 = vadd.f32 %v624_v61, %v501_v2  ;;  %v639_v10 = vmax.f32 %v621_v8, 0.0 }
 0x212   :  { %1053 = vpow2.f32 %v886_v59  ;;  %v887_v62 = vmul.f32 -1.442695, %v623_v60 }
 0x213   :  { %v640_v11 = vmax.f32 %v625_v9, 0.0  ;;  %v641_v12 = vsub.f32 %v639_v10, %v1280_v30 }
 0x214   :  { %1055 = vpow2.f32 %v887_v62 }
 0x215   :  { %v642_v17 = vsub.f32 %v640_v11, %v1282_v31 }
 0x21c   :  { %v1054_v1 = vpop.eup %1053 }
 0x21d   :  { %v633_v3 = vadd.f32 1.0, %v1054_v1 }
 0x21e   :  { %v1056_v4 = vpop.eup %1055 }
 0x21f   :  { %1057 = vrcp.f32 %v633_v3  ;;  %v634_v7 = vadd.f32 1.0, %v1056_v4 }
 0x221   :  { %1059 = vrcp.f32 %v634_v7 }
 0x229   :  { %v1058_v13 = vpop.eup %1057 }
 0x22a   :  { %v643_v14 = vmul.f32 %v1058_v13, %v641_v12 }
 0x22b   :  { %v1060_v18 = vpop.eup %1059 }
 0x22c   :  { %v644_v19 = vmul.f32 %v1060_v18, %v642_v17  ;;  %v645_v20 = vadd.f32 %v1280_v30, %v643_v14 }
 0x22e   :  { %v646_v21 = vadd.f32 %v1282_v31, %v644_v19 }
 0x230   :  { %v647_v22 = vpack.c.bf16 %v646_v21, %v645_v20 }
 0x232   :  { %791 = vmatmul.mubr.bf16.vlgmr.msra.gmra.mrb[4].mxu1 %v647_v22 }
 0x305   :  { %v792_v25 = vpop.f32.mrb[4].mxu1 }
 0x306   :  { %v793_v26 = vadd.f32 %v792_v25, %v671_v24  ;;  %v794_v27 = vpop.f32.mrb[5].mxu1 }
 0x307   :  { %v796_v28 = vpop.f32.mrb[6].mxu1  ;;  %v795_v33 = vadd.f32 %v794_v27, %v675_v16 }
 0x308   :  { %v905_v29 = vmul.f32 -1.442695, %v793_v26  ;;  %v797_v5 = vadd.f32 %v796_v28, %v671_v24  ;;  %v798_v6 = vpop.f32.mrb[7].mxu1 }
 0x309   :  { %v799_v34 = vadd.f32 %v798_v6, %v675_v16  ;;  %v813_v35 = vmax.f32 %v795_v33, 0.0 }
 0x30a   :  { %1061 = vpow2.f32 %v905_v29  ;;  %v906_v0 = vmul.f32 -1.442695, %v797_v5 }
 0x30b   :  { %v814_v36 = vmax.f32 %v799_v34, 0.0  ;;  %v815_v37 = vsub.f32 %v813_v35, %v645_v20 }
 0x30c   :  { %1063 = vpow2.f32 %v906_v0 }
 0x30d   :  { %v816_v40 = vsub.f32 %v814_v36, %v646_v21 }
 0x314   :  { %v1062_v15 = vpop.eup %1061 }
 0x315   :  { %v807_v30 = vadd.f32 1.0, %v1062_v15 }
 0x316   :  { %v1064_v31 = vpop.eup %1063 }
 0x317   :  { %1065 = vrcp.f32 %v807_v30  ;;  %v808_v32 = vadd.f32 1.0, %v1064_v31 }
 0x319   :  { %1067 = vrcp.f32 %v808_v32 }
 0x321   :  { %v1066_v38 = vpop.eup %1065 }
 0x322   :  { %v817_v39 = vmul.f32 %v1066_v38, %v815_v37 }
 0x323   :  { %v1068_v41 = vpop.eup %1067 }
 0x324   :  { %v818_v42 = vmul.f32 %v1068_v41, %v816_v40  ;;  %v819_v43 = vadd.f32 %v817_v39, %v645_v20 }
 0x326   :  { %v820_v44 = vadd.f32 %v818_v42, %v646_v21  ;;  %821 = vst [vmem:[#allocation7] sm:$0xff] %v819_v43 }
 0x328   :  { %822 = vst [vmem:[#allocation7 + $0x8] sm:$0xff] %v820_v44 }
 0x329   :  { %1124 = shalt.err (!%p1121_p6)
}
 0x32a   :  { %s1125_s10 = scalar_lea.hbm %s1316_s5, 256 }
 0x32b   :  { %p1126_p7 = scmp.ne.s32.totalorder %s1316_s5, %s1125_s10  ;;  %p1129_p8 = scmp.lt.u32.totalorder %s1125_s10, %s1316_s5 }
 0x32d   :  { %p1131_p9 = pnand %p1129_p8, %p1126_p7 }
 0x32f   :  { %1134 = shalt.err (!%p1131_p9)
}
 0x330   :  { %834 = dma.vmem_to_hbm [thread:$0]  %s829_s6, 256, %s1316_s5, [#allocation4], %s1145_s1, %s1145_s1, %s1146_s17  }
 0x331   :  { %1139 = dma.done.wait [#allocation4], 256  }
 0x332   :  { %1140 = vsyncadd [#allocation4], 4294967040 }
 0x333   :  { %838 = vsyncpa [#allocation3], 1 }
 0x334   :  { %839 = vsyncpa [#allocation6], 1 }
 0x335   :  { %840 = vsyncpa [#allocation4], 1 }

</bundles_post_ra>
